<compile_context>
chip_gen: v7x
topology: tpu7x:2x2x1
jax: 0.10.0
libtpu: 0.0.40
codegen_flags: <defaults>
</compile_context>

<pallas_src>
import functools

import jax
import jax.numpy as jnp
from jax.experimental import pallas as pl
from jax.experimental.pallas import tpu as pltpu

EMBEDDING_DIM = 8
H1 = 64
H2 = 32

LANE = 128
DEFAULT_TILE_B = 8192  # batch rows (lanes) per grid step; multiple of 128


def ncf_fused_kernel(uid_ref, rid_ref, table_ref, w1_ref, b1_ref,
                     w2_ref, b2_ref, w3_ref, b3_ref, o_ref):
    """One batch tile, fully fused (gather + MLP), transposed (features x batch).

    uid_ref   : (1, TILE_B) int32   user ids (batch on lanes)
    rid_ref   : (1, TILE_B) int32   restaurant ids, pre-offset by num_users
    table_ref : (2E, URp)   f32     block-diag [user_emb^T | restaurant_emb^T], resident
    w1_ref    : (H1, 2E)    f32     fc1 weight (transposed), resident
    b1_ref    : (H1, 1)
    w2_ref    : (H2, H1)    fc2 weight (transposed), resident
    b2_ref    : (H2, 1)
    w3_ref    : (H2, 1)     fc3 weight as a column
    b3_ref    : (1, 1)
    o_ref     : (1, TILE_B) f32     lane-dense output tile
    """
    urp = table_ref.shape[1]
    tb = o_ref.shape[1]

    # Combined one-hot (two 1s per column: one in the user block, one in the
    # restaurant block).  Built on the VPU, consumed by the MXU.
    iota = jax.lax.broadcasted_iota(jnp.int32, (urp, tb), 0)
    onehot = ((iota == uid_ref[...]) | (iota == rid_ref[...])).astype(jnp.float32)

    # Fused gather + concat: block-diagonal table makes x = [user_emb; rest_emb].
    x = jnp.dot(table_ref[...], onehot, preferred_element_type=jnp.float32)  # (2E, tb)

    # fc1 + ReLU.  Single merged matmul: (H1, 2E) @ (2E, tb)
    h1 = jnp.maximum(
        jnp.dot(w1_ref[...], x, preferred_element_type=jnp.float32) + b1_ref[...], 0.0)

    # fc2 + ReLU.  (H2, H1) @ (H1, tb)
    h2 = jnp.maximum(
        jnp.dot(w2_ref[...], h1, preferred_element_type=jnp.float32) + b2_ref[...], 0.0)

    # fc3: single-output linear -> VPU multiply + sublane reduce (XLU slot),
    # lands lane-dense as (1, tb).
    out = jnp.sum(h2 * w3_ref[...], axis=0, keepdims=True) + b3_ref[...]
    o_ref[...] = out.astype(o_ref.dtype)


def _round_up(x, m):
    return (x + m - 1) // m * m


def _resident(shape):
    # Full-array block with a constant index_map: DMA'd once, stays in VMEM.
    return pl.BlockSpec(shape, lambda i: (0,) * len(shape))


@functools.partial(jax.jit, static_argnames=("tile_b",))
def neural_cf_forward(user_id, restaurant_id, params, *, tile_b=DEFAULT_TILE_B):
    tu = params["user_embedding"]         # (U, E)
    tr = params["restaurant_embedding"]   # (R, E)
    U, E = tu.shape
    R = tr.shape[0]
    n_h1 = params["w1"].shape[1]
    n_h2 = params["w2"].shape[1]
    B = user_id.shape[0]

    # Lane-aligned batch tile, capped by the batch; prefer >=2 tiles so v7x's
    # second TensorCore gets work.
    tb = min(tile_b, _round_up(B, LANE))
    if B > LANE and tb > LANE and _round_up(B, tb) == tb:
        tb = _round_up(tb // 2, LANE)
    Bp = _round_up(B, tb)
    grid = (Bp // tb,)

    # Streamed inputs: only the ids.  Pad with a VALID index (0) - no bounds check
    # on VMEM refs.  Restaurant ids are pre-offset into the combined table.
    uid = jnp.pad(user_id.astype(jnp.int32), (0, Bp - B)).reshape(1, Bp)
    rid = jnp.pad(restaurant_id.astype(jnp.int32), (0, Bp - B)).reshape(1, Bp) + U

    # Resident block-diagonal, feature-major combined embedding table.
    # Rows 0:E  = user features (columns 0:U), rows E:2E = restaurant features
    # (columns U:U+R).  Padded columns never match an id -> contribute zero.
    URp = _round_up(U + R, 8)
    table = jnp.zeros((2 * E, URp), jnp.float32)
    table = table.at[:E, :U].set(tu.T)
    table = table.at[E:, U:U + R].set(tr.T)

    # Resident, pre-transposed MLP weights (tiny; built once per call in XLA glue).
    w1_t = params["w1"].T                       # (H1, 2E)
    b1_c = params["b1"].reshape(n_h1, 1)
    w2_t = params["w2"].T                       # (H2, H1)
    b2_c = params["b2"].reshape(n_h2, 1)
    w3_c = params["w3"].reshape(n_h2, 1)
    b3_c = params["b3"].reshape(1, 1)

    out_t = pl.pallas_call(
        ncf_fused_kernel,
        out_shape=jax.ShapeDtypeStruct((1, Bp), jnp.float32),
        grid=grid,
        in_specs=[
            pl.BlockSpec((1, tb), lambda i: (0, i)),   # user ids tile
            pl.BlockSpec((1, tb), lambda i: (0, i)),   # restaurant ids tile (offset)
            _resident((2 * E, URp)),                   # combined embedding table
            _resident((n_h1, 2 * E)),                  # fc1 weight (merged halves)
            _resident((n_h1, 1)),                      # b1
            _resident((n_h2, n_h1)),                   # fc2 weight
            _resident((n_h2, 1)),                      # b2
            _resident((n_h2, 1)),                      # fc3 weight column
            _resident((1, 1)),                         # b3
        ],
        out_specs=pl.BlockSpec((1, tb), lambda i: (0, i)),
        compiler_params=pltpu.CompilerParams(
            dimension_semantics=("parallel",),         # batch tiles -> both TCs on v7x
            vmem_limit_bytes=32 * 1024 * 1024,         # ~6 MiB/tile at tb=8192; safe everywhere
        ),
    )(uid, rid, table, w1_t, b1_c, w2_t, b2_c, w3_c, b3_c)

    return out_t[0, :B].reshape(B, 1)


def init_params(key, num_users, num_restaurants, embedding_dim):
    ks = jax.random.split(key, 8)

    def linear(kw, kb, fan_in, fan_out):
        bound = 1.0 / jnp.sqrt(fan_in)
        w = jax.random.uniform(kw, (fan_in, fan_out), jnp.float32, -bound, bound)
        b = jax.random.uniform(kb, (1, fan_out), jnp.float32, -bound, bound)
        return w, b

    w1, b1 = linear(ks[2], ks[3], embedding_dim * 2, H1)
    w2, b2 = linear(ks[4], ks[5], H1, H2)
    w3, b3 = linear(ks[6], ks[7], H2, 1)
    return {
        # nn.Embedding default init: N(0, 1)
        "user_embedding": jax.random.normal(ks[0], (num_users, embedding_dim), jnp.float32),
        "restaurant_embedding": jax.random.normal(ks[1], (num_restaurants, embedding_dim), jnp.float32),
        "w1": w1, "b1": b1,
        "w2": w2, "b2": b2,
        "w3": w3, "b3": b3,
    }


def _reference(params, user_id, restaurant_id):
    # Pure-JAX reference of the PyTorch forward pass.
    ue = jnp.take(params["user_embedding"], user_id, axis=0)
    re = jnp.take(params["restaurant_embedding"], restaurant_id, axis=0)
    x = jnp.concatenate([ue, re], axis=-1)
    h1 = jnp.maximum(x @ params["w1"] + params["b1"], 0.0)
    h2 = jnp.maximum(h1 @ params["w2"] + params["b2"], 0.0)
    return h2 @ params["w3"] + params["b3"]


if __name__ == "__main__":
    key = jax.random.PRNGKey(0)
    num_users = 32
    num_restaurants = 24

    k_params, k_u, k_r, k_u2, k_r2 = jax.random.split(key, 5)
    params = init_params(k_params, num_users, num_restaurants, EMBEDDING_DIM)

    # Small batch (single tile).
    batch = 8
    user_id = jax.random.randint(k_u, (batch,), 0, num_users, dtype=jnp.int32)
    restaurant_id = jax.random.randint(k_r, (batch,), 0, num_restaurants, dtype=jnp.int32)

    out = neural_cf_forward(user_id, restaurant_id, params)
    jax.block_until_ready(out)
    ref = _reference(params, user_id, restaurant_id)
    assert out.shape == (batch, 1)
    assert jnp.allclose(out, ref, atol=1e-4, rtol=1e-4), float(jnp.max(jnp.abs(out - ref)))

    # Multi-tile batch (exercises >=2 grid tiles + batch padding).
    batch2 = 300
    user_id2 = jax.random.randint(k_u2, (batch2,), 0, num_users, dtype=jnp.int32)
    restaurant_id2 = jax.random.randint(k_r2, (batch2,), 0, num_restaurants, dtype=jnp.int32)

    out2 = neural_cf_forward(user_id2, restaurant_id2, params)
    jax.block_until_ready(out2)
    ref2 = _reference(params, user_id2, restaurant_id2)
    assert out2.shape == (batch2, 1)
    assert jnp.allclose(out2, ref2, atol=1e-4, rtol=1e-4), float(jnp.max(jnp.abs(out2 - ref2)))

    print("KERNEL_OK")
</pallas_src>

<mosaic_0001>
module attributes {stable_mosaic.version = 11 : i64} {
  func.func @ncf_fused_kernel(%arg0: i32, %arg1: memref<1x128xi32, #tpu.memory_space<vmem>>, %arg2: memref<1x128xi32, #tpu.memory_space<vmem>>, %arg3: memref<16x56xf32, #tpu.memory_space<vmem>>, %arg4: memref<64x16xf32, #tpu.memory_space<vmem>>, %arg5: memref<64x1xf32, #tpu.memory_space<vmem>>, %arg6: memref<32x64xf32, #tpu.memory_space<vmem>>, %arg7: memref<32x1xf32, #tpu.memory_space<vmem>>, %arg8: memref<32x1xf32, #tpu.memory_space<vmem>>, %arg9: memref<1x1xf32, #tpu.memory_space<vmem>>, %arg10: memref<1x128xf32, #tpu.memory_space<vmem>>) attributes {dimension_semantics = [#tpu.dimension_semantics<parallel>], iteration_bounds = array<i64: 1>, scalar_prefetch = 0 : i64, scratch_operands = 0 : i64, tpu.core_type = #tpu.core_type<tc>, window_params = [{transform_indices = @transform_0, window_bounds = array<i64: 1, 128>}, {transform_indices = @transform_1, window_bounds = array<i64: 1, 128>}, {pipeline_mode = #tpu.pipeline_mode<synchronous>, transform_indices = @transform_2, window_bounds = array<i64: 16, 56>}, {pipeline_mode = #tpu.pipeline_mode<synchronous>, transform_indices = @transform_3, window_bounds = array<i64: 64, 16>}, {pipeline_mode = #tpu.pipeline_mode<synchronous>, transform_indices = @transform_4, window_bounds = array<i64: 64, 1>}, {pipeline_mode = #tpu.pipeline_mode<synchronous>, transform_indices = @transform_5, window_bounds = array<i64: 32, 64>}, {pipeline_mode = #tpu.pipeline_mode<synchronous>, transform_indices = @transform_6, window_bounds = array<i64: 32, 1>}, {pipeline_mode = #tpu.pipeline_mode<synchronous>, transform_indices = @transform_7, window_bounds = array<i64: 32, 1>}, {pipeline_mode = #tpu.pipeline_mode<synchronous>, transform_indices = @transform_8, window_bounds = array<i64: 1, 1>}, {transform_indices = @transform_9, window_bounds = array<i64: 1, 128>}]} {
    %0 = tpu.iota {dimensions = array<i32: 0>} : vector<56x128xi32>
    %c0 = arith.constant 0 : index
    %c0_0 = arith.constant 0 : index
    %1 = vector.load %arg1[%c0, %c0_0] : memref<1x128xi32, #tpu.memory_space<vmem>>, vector<1x128xi32>
    %2 = vector.broadcast %1 : vector<1x128xi32> to vector<56x128xi32>
    %3 = arith.cmpi eq, %0, %2 : vector<56x128xi32>
    %c0_1 = arith.constant 0 : index
    %c0_2 = arith.constant 0 : index
    %4 = vector.load %arg2[%c0_1, %c0_2] : memref<1x128xi32, #tpu.memory_space<vmem>>, vector<1x128xi32>
    %5 = vector.broadcast %4 : vector<1x128xi32> to vector<56x128xi32>
    %6 = arith.cmpi eq, %0, %5 : vector<56x128xi32>
    %7 = arith.ori %3, %6 : vector<56x128xi1>
    %8 = arith.extui %7 : vector<56x128xi1> to vector<56x128xi32>
    %9 = arith.sitofp %8 : vector<56x128xi32> to vector<56x128xf32>
    %c0_3 = arith.constant 0 : index
    %c0_4 = arith.constant 0 : index
    %10 = vector.load %arg3[%c0_3, %c0_4] : memref<16x56xf32, #tpu.memory_space<vmem>>, vector<16x56xf32>
    %cst = arith.constant dense<0.000000e+00> : vector<16x128xf32>
    %11 = tpu.matmul %10, %9, %cst {dimension_numbers = #tpu.dot_dimension_numbers<[1], [0], [0], [1], [0, 0, 1, 1], [], []>} : vector<16x56xf32>, vector<56x128xf32>, vector<16x128xf32> -> vector<16x128xf32>
    %c0_5 = arith.constant 0 : index
    %c0_6 = arith.constant 0 : index
    %12 = vector.load %arg4[%c0_5, %c0_6] : memref<64x16xf32, #tpu.memory_space<vmem>>, vector<64x16xf32>
    %cst_7 = arith.constant dense<0.000000e+00> : vector<64x128xf32>
    %13 = tpu.matmul %12, %11, %cst_7 {dimension_numbers = #tpu.dot_dimension_numbers<[1], [0], [0], [1], [0, 0, 1, 1], [], []>} : vector<64x16xf32>, vector<16x128xf32>, vector<64x128xf32> -> vector<64x128xf32>
    %c0_8 = arith.constant 0 : index
    %c0_9 = arith.constant 0 : index
    %14 = vector.load %arg5[%c0_8, %c0_9] : memref<64x1xf32, #tpu.memory_space<vmem>>, vector<64x1xf32>
    %15 = vector.broadcast %14 : vector<64x1xf32> to vector<64x128xf32>
    %16 = arith.addf %13, %15 : vector<64x128xf32>
    %cst_10 = arith.constant 0.000000e+00 : f32
    %17 = vector.broadcast %cst_10 : f32 to vector<64x128xf32>
    %18 = arith.maximumf %16, %17 : vector<64x128xf32>
    %c0_11 = arith.constant 0 : index
    %c0_12 = arith.constant 0 : index
    %19 = vector.load %arg6[%c0_11, %c0_12] : memref<32x64xf32, #tpu.memory_space<vmem>>, vector<32x64xf32>
    %cst_13 = arith.constant dense<0.000000e+00> : vector<32x128xf32>
    %20 = tpu.matmul %19, %18, %cst_13 {dimension_numbers = #tpu.dot_dimension_numbers<[1], [0], [0], [1], [0, 0, 1, 1], [], []>} : vector<32x64xf32>, vector<64x128xf32>, vector<32x128xf32> -> vector<32x128xf32>
    %c0_14 = arith.constant 0 : index
    %c0_15 = arith.constant 0 : index
    %21 = vector.load %arg7[%c0_14, %c0_15] : memref<32x1xf32, #tpu.memory_space<vmem>>, vector<32x1xf32>
    %22 = vector.broadcast %21 : vector<32x1xf32> to vector<32x128xf32>
    %23 = arith.addf %20, %22 : vector<32x128xf32>
    %cst_16 = arith.constant 0.000000e+00 : f32
    %24 = vector.broadcast %cst_16 : f32 to vector<32x128xf32>
    %25 = arith.maximumf %23, %24 : vector<32x128xf32>
    %c0_17 = arith.constant 0 : index
    %c0_18 = arith.constant 0 : index
    %26 = vector.load %arg8[%c0_17, %c0_18] : memref<32x1xf32, #tpu.memory_space<vmem>>, vector<32x1xf32>
    %27 = vector.broadcast %26 : vector<32x1xf32> to vector<32x128xf32>
    %28 = arith.mulf %25, %27 : vector<32x128xf32>
    %cst_19 = arith.constant dense<0.000000e+00> : vector<128xf32>
    %29 = vector.multi_reduction <add>, %28, %cst_19 [0] : vector<32x128xf32> to vector<128xf32>
    %30 = vector.shape_cast %29 : vector<128xf32> to vector<1x128xf32>
    %c0_20 = arith.constant 0 : index
    %c0_21 = arith.constant 0 : index
    %31 = vector.load %arg9[%c0_20, %c0_21] : memref<1x1xf32, #tpu.memory_space<vmem>>, vector<1x1xf32>
    %32 = vector.broadcast %31 : vector<1x1xf32> to vector<1x128xf32>
    %33 = arith.addf %30, %32 : vector<1x128xf32>
    %c0_22 = arith.constant 0 : index
    %c0_23 = arith.constant 0 : index
    %34 = vector.load %arg10[%c0_22, %c0_23] : memref<1x128xf32, #tpu.memory_space<vmem>>, vector<1x128xf32>
    tpu.vector_store %arg10[%c0_22, %c0_23], %33 {strides = array<i32>} : memref<1x128xf32, #tpu.memory_space<vmem>>, vector<1x128xf32>,
    return
  }
  func.func @transform_0(%arg0: i32) -> (i32, i32) {
    %c0_i32 = arith.constant 0 : i32
    %c0_i32_0 = arith.constant 0 : i32
    return %c0_i32, %arg0 : i32, i32
  }
  func.func @transform_1(%arg0: i32) -> (i32, i32) {
    %c0_i32 = arith.constant 0 : i32
    %c0_i32_0 = arith.constant 0 : i32
    return %c0_i32, %arg0 : i32, i32
  }
  func.func @transform_2(%arg0: i32) -> (i32, i32) {
    %c0_i32 = arith.constant 0 : i32
    %c0_i32_0 = arith.constant 0 : i32
    %c0_i32_1 = arith.constant 0 : i32
    return %c0_i32, %c0_i32_0 : i32, i32
  }
  func.func @transform_3(%arg0: i32) -> (i32, i32) {
    %c0_i32 = arith.constant 0 : i32
    %c0_i32_0 = arith.constant 0 : i32
    %c0_i32_1 = arith.constant 0 : i32
    return %c0_i32, %c0_i32_0 : i32, i32
  }
  func.func @transform_4(%arg0: i32) -> (i32, i32) {
    %c0_i32 = arith.constant 0 : i32
    %c0_i32_0 = arith.constant 0 : i32
    %c0_i32_1 = arith.constant 0 : i32
    return %c0_i32, %c0_i32_0 : i32, i32
  }
  func.func @transform_5(%arg0: i32) -> (i32, i32) {
    %c0_i32 = arith.constant 0 : i32
    %c0_i32_0 = arith.constant 0 : i32
    %c0_i32_1 = arith.constant 0 : i32
    return %c0_i32, %c0_i32_0 : i32, i32
  }
  func.func @transform_6(%arg0: i32) -> (i32, i32) {
    %c0_i32 = arith.constant 0 : i32
    %c0_i32_0 = arith.constant 0 : i32
    %c0_i32_1 = arith.constant 0 : i32
    return %c0_i32, %c0_i32_0 : i32, i32
  }
  func.func @transform_7(%arg0: i32) -> (i32, i32) {
    %c0_i32 = arith.constant 0 : i32
    %c0_i32_0 = arith.constant 0 : i32
    %c0_i32_1 = arith.constant 0 : i32
    return %c0_i32, %c0_i32_0 : i32, i32
  }
  func.func @transform_8(%arg0: i32) -> (i32, i32) {
    %c0_i32 = arith.constant 0 : i32
    %c0_i32_0 = arith.constant 0 : i32
    %c0_i32_1 = arith.constant 0 : i32
    return %c0_i32, %c0_i32_0 : i32, i32
  }
  func.func @transform_9(%arg0: i32) -> (i32, i32) {
    %c0_i32 = arith.constant 0 : i32
    %c0_i32_0 = arith.constant 0 : i32
    return %c0_i32, %arg0 : i32, i32
  }
}

</mosaic_0001>

<bundles_post_ra>
// kernel: neural_cf_forward.1
= control target key start
LH: loop header
LB: loop body
LE: loop exit
PB: predicated region body
PF: predicated region fallthrough
CT: control target
= control target key end

     0   :  { %v34_v0 = vlaneseq  ;;  %vm897_vm0 = vcmask 457728   ;;  %v701_v11 = vmov 1.0|1.0   ;;  %v702_v13 = vmov 1.0   ;;  %s887_s0 = inlined_call_operand.vmem [shape: s32[1,128], index: 0, kind: input, shape index: {}]   ;;  %s888_s1 = inlined_call_operand.vmem [shape: s32[1,128], index: 1, kind: input, shape index: {}]   ;;  %s889_s2 = inlined_call_operand.vmem [shape: f32[16,56], index: 2, kind: input, shape index: {}]   ;;  %s890_s3 = inlined_call_operand.vmem [shape: f32[64,16], index: 3, kind: input, shape index: {}]   ;;  %s891_s4 = inlined_call_operand.vmem [shape: f32[64,1], index: 4, kind: input, shape index: {}]   ;;  %s892_s8 = inlined_call_operand.<no memory space> [shape: f32[1,1], index: 8, kind: input, shape index: {}]   ;;  %s893_s6 = inlined_call_operand.vmem [shape: f32[32,1], index: 6, kind: input, shape index: {}]   ;;  %s894_s7 = inlined_call_operand.vmem [shape: f32[32,1], index: 7, kind: input, shape index: {}]   ;;  %s895_s5 = inlined_call_operand.vmem [shape: f32[32,64], index: 5, kind: input, shape index: {}]   ;;  %s896_s9 = inlined_call_operand.vmem [shape: f32[1,128], index: 9, kind: output, shape index: {}]  }
   0x1   :  { %v548_v1 = vld [vmem:[%s887_s0] ss:$0 sm:$0xff]  ;;  %v88_v14 = vld [vmem:[%s889_s2 + $0x8] sm:$0xff]  ;;  %v703_v16 = vmov 0   ;;  %v181_v18 = vld [vmem:[%s891_s4 + $0x10] sm:$0xff]  ;;  %v14_v19 = vstv %s892_s8 }
   0x2   :  { %v549_v2 = vld [vmem:[%s888_s1] ss:$0 sm:$0xff]  ;;  %v763_v4 = vshrl.u32 %v34_v0, 7  ;;  %699 = vset.pattern.permute.xlu0 %v703_v16  ;;  %700 = vset.pattern.permute.xlu1 %v703_v16  ;;  %15 = vst [vmem:[#allocation2] sm:$0x1] %v14_v19  ;;  %v180_v20 = vld [vmem:[%s891_s4 + $0x8] sm:$0xff] }
   0x3   :  { %v87_v3 = vld [vmem:[%s889_s2] sm:$0xff]  ;;  %199 = vperm.xlu1 %700, %v181_v18   ;;  %v182_v21 = vld [vmem:[%s891_s4 + $0x18] sm:$0xff]  ;;  %v184_v23 = vld [vmem:[%s891_s4 + $0x28] sm:$0xff] }
   0x4   :  { %623 = vmatprep.mubr.msk.f32.mxu0 %vm897_vm0, %v87_v3  ;;  %v36_v5 = vadd.s32 8, %v763_v4  ;;  %vm47_vm1 = vcmp.eq.s32.totalorder %v763_v4, %v548_v1  ;;  %vm59_vm2 = vcmp.eq.s32.totalorder %v763_v4, %v549_v2  ;;  %v37_v6 = vadd.s32 16, %v763_v4  ;;  %v171_v15 = vld [vmem:[%s890_s3] sm:$0xff]  ;;  %v185_v24 = vld [vmem:[%s891_s4 + $0x30] sm:$0xff]  ;;  %v186_v25 = vld [vmem:[%s891_s4 + $0x38] sm:$0xff] }
   0x5   :  { %vm770_vm3 = vmor %vm47_vm1, %vm59_vm2  ;;  %v38_v8 = vadd.s32 24, %v763_v4  ;;  %v39_v9 = vadd.s32 32, %v763_v4  ;;  %v40_v10 = vadd.s32 40, %v763_v4  ;;  %v41_v12 = vadd.s32 48, %v763_v4  ;;  %v179_v17 = vld [vmem:[%s891_s4] sm:$0xff]  ;;  %v370_v27 = vld [vmem:[%s893_s6 + $0x8] sm:$0xff] }
   0x6   :  { %vm48_vm4 = vcmp.eq.s32.totalorder %v36_v5, %v548_v1  ;;  %vm60_vm5 = vcmp.eq.s32.totalorder %v36_v5, %v549_v2  ;;  %vm49_vm6 = vcmp.eq.s32.totalorder %v37_v6, %v548_v1  ;;  %vm61_vm7 = vcmp.eq.s32.totalorder %v37_v6, %v549_v2  ;;  %189 = vperm.xlu0 %699, %v179_v17   ;;  %v183_v22 = vld [vmem:[%s891_s4 + $0x20] sm:$0xff]  ;;  %v371_v28 = vld [vmem:[%s893_s6 + $0x10] sm:$0xff]  ;;  %v372_v29 = vld [vmem:[%s893_s6 + $0x18] sm:$0xff] }
   0x7   :  { %vm67_vm8 = vmor %vm48_vm4, %vm60_vm5  ;;  %vm50_vm9 = vcmp.eq.s32.totalorder %v38_v8, %v548_v1  ;;  %vm62_vm10 = vcmp.eq.s32.totalorder %v38_v8, %v549_v2  ;;  %vm51_vm13 = vcmp.eq.s32.totalorder %v39_v9, %v548_v1  ;;  %vm63_vm14 = vcmp.eq.s32.totalorder %v39_v9, %v549_v2  ;;  %204 = vperm.xlu1 %700, %v182_v21   ;;  %v369_v26 = vld [vmem:[%s893_s6] sm:$0xff]  ;;  %v496_v31 = vld [vmem:[%s894_s7 + $0x8] sm:$0xff] }
   0x8   :  { %vm664_vm11 = vmpackc.low %vm67_vm8, %vm770_vm3  ;;  %vm52_vm1 = vcmp.eq.s32.totalorder %v40_v10, %v548_v1  ;;  %vm64_vm2 = vcmp.eq.s32.totalorder %v40_v10, %v549_v2  ;;  %vm53_vm3 = vcmp.eq.s32.totalorder %v41_v12, %v548_v1  ;;  %vm65_vm8 = vcmp.eq.s32.totalorder %v41_v12, %v549_v2  ;;  %v495_v30 = vld [vmem:[%s894_s7] sm:$0xff]  ;;  %v497_v32 = vld [vmem:[%s894_s7 + $0x10] sm:$0xff] }
   0x9   :  { %665 = vmatprep.subr.msk.bf16.mxu0 %vm664_vm11, %v701_v11  ;;  %vm68_vm12 = vmor %vm49_vm6, %vm61_vm7  ;;  %v498_v33 = vld [vmem:[%s894_s7 + $0x18] sm:$0xff]  ;;  %v532_v34 = vld [vmem:[#allocation2] sm:$0x1] }
   0xa   :  { %667 = vmatpush3.bf16.msk.msra.mxu0 %vm664_vm11, %v701_v11  ;;  %vm69_vm15 = vmor %vm50_vm9, %vm62_vm10  ;;  %vm900_vm9 = vcmask 457728   ;;  %vm227_vm10 = vcmask 130048   ;;  %194 = vperm.xlu0 %699, %v180_v20   ;;  %v172_v38 = vld [vmem:[%s890_s3 + $0x8] sm:$0xff]  ;;  %v173_v39 = vld [vmem:[%s890_s3 + $0x10] sm:$0xff] }
   0xb   :  { %vm668_vm0 = vmpackc.low %vm69_vm15, %vm68_vm12  ;;  %630 = vmatprep.mubr.msk.f32.mxu1 %vm227_vm10, %v171_v15  ;;  %214 = vperm.xlu1 %700, %v184_v23   ;;  %v174_v40 = vld [vmem:[%s890_s3 + $0x18] sm:$0xff]  ;;  %v175_v41 = vld [vmem:[%s890_s3 + $0x20] sm:$0xff] }
   0xc   :  { %669 = vmatprep.subr.msk.bf16.mxu0 %vm668_vm0, %v701_v11  ;;  %vm70_vm4 = vmor %vm51_vm13, %vm63_vm14  ;;  %v176_v42 = vld [vmem:[%s890_s3 + $0x28] sm:$0xff]  ;;  %v177_v43 = vld [vmem:[%s890_s3 + $0x30] sm:$0xff] }
   0xd   :  { %vm71_vm5 = vmor %vm52_vm1, %vm64_vm2  ;;  %v178_v44 = vld [vmem:[%s890_s3 + $0x38] sm:$0xff]  ;;  %v365_v45 = vld [vmem:[%s895_s5] sm:$0xff] }
   0xe   :  { %671 = vmatpush3.bf16.msk.msra.mxu0 %vm668_vm0, %v701_v11  ;;  %vm672_vm6 = vmpackc.low %vm71_vm5, %vm70_vm4  ;;  %209 = vperm.xlu0 %699, %v183_v22   ;;  %vm393_vm0 = vcmask 523264   ;;  %v366_v19 = vld [vmem:[%s895_s5 + $0x8] sm:$0xff]  ;;  %v367_v20 = vld [vmem:[%s895_s5 + $0x10] sm:$0xff] }
   0xf   :  { %673 = vmatprep.subr.msk.bf16.mxu0 %vm672_vm6, %v701_v11  ;;  %vm72_vm7 = vmor %vm53_vm3, %vm65_vm8  ;;  %224 = vperm.xlu1 %700, %v186_v25   ;;  %v368_v21 = vld [vmem:[%s895_s5 + $0x18] sm:$0xff] }
  0x12   :  { %675 = vmatpush3.bf16.msk.msra.mxu0 %vm672_vm6, %v701_v11  ;;  %219 = vperm.xlu0 %699, %v185_v24  }
  0x13   :  { %621 = vmatprep.subr.msk.mxu0 %vm72_vm7, %v702_v13  ;;  %380 = vperm.xlu1 %700, %v370_v27  }
  0x16   :  { %622 = vmatpush3.msk.msra.mxu0 %vm72_vm7, %v702_v13  ;;  %375 = vperm.xlu0 %699, %v369_v26  }
  0x17   :  { %624 = vmatmul.mubr.msk.f32.vlgmr.msra.gmra.mrb[0].mxu0 %vm900_vm9, %v88_v14  ;;  %390 = vperm.xlu1 %700, %v372_v29  }
  0x1a   :  { %385 = vperm.xlu0 %699, %v371_v28  }
  0x1b   :  { %506 = vperm.xlu1 %700, %v496_v31  }
  0x1e   :  { %501 = vperm.xlu0 %699, %v495_v30  }
  0x1f   :  { %516 = vperm.xlu1 %700, %v498_v33  }
  0x22   :  { %511 = vperm.xlu0 %699, %v497_v32  }
  0x26   :  { %535 = vperm.xlu0 %699, %v532_v34  }
  0x82   :  { %v200_v47 = vpop.permute.xlu1 %199 }
  0x85   :  { %v190_v46 = vpop.permute.xlu0 %189 }
  0x86   :  { %v205_v49 = vpop.permute.xlu1 %204 }
  0x89   :  { %v195_v48 = vpop.permute.xlu0 %194 }
  0x8a   :  { %v215_v59 = vpop.permute.xlu1 %214 }
  0x8d   :  { %v210_v62 = vpop.permute.xlu0 %209 }
  0x8e   :  { %v225_v8 = vpop.permute.xlu1 %224 }
  0x91   :  { %v220_v11 = vpop.permute.xlu0 %219 }
  0x92   :  { %v381_v23 = vpop.permute.xlu1 %380 }
  0x95   :  { %v376_v22 = vpop.permute.xlu0 %375 }
  0x96   :  { %v391_v25 = vpop.permute.xlu1 %390 }
  0x99   :  { %v386_v24 = vpop.permute.xlu0 %385 }
  0x9a   :  { %v507_v32 = vpop.permute.xlu1 %506 }
  0x9d   :  { %v502_v30 = vpop.permute.xlu0 %501 }
  0xea   :  { %v625_v35 = vpop.f32.mrb[0].mxu0 }
  0xeb   :  { %v162_v36 = vpop.f32.mrb[1].mxu0 }
  0xec   :  { %v676_v37 = vpack.c.bf16 %v625_v35, %v162_v36 }
  0xee   :  { %677 = vmatprep.subr.bf16.mxu1 %v676_v37 }
  0xef   :  { %679 = vmatpush3.bf16.msra.mxu1 %v676_v37 }
  0xf2   :  { %631 = vmatmul.mubr.msk.f32.vlgmr.msra.gmra.mrb[0].mxu1 %vm227_vm10, %v172_v38 }
  0xf3   :  { %633 = vmatprep.mubr.msk.f32.mxu1 %vm227_vm10, %v173_v39 }
  0xf6   :  { %634 = vmatmul.mubr.msk.f32.gmra.mrb[2].mxu1 %vm227_vm10, %v174_v40 }
  0xf7   :  { %636 = vmatprep.mubr.msk.f32.mxu1 %vm227_vm10, %v175_v41 }
  0xfa   :  { %637 = vmatmul.mubr.msk.f32.gmra.mrb[4].mxu1 %vm227_vm10, %v176_v42 }
  0xfb   :  { %639 = vmatprep.mubr.msk.f32.mxu1 %vm227_vm10, %v177_v43  ;;  %v512_v43 = vpop.permute.xlu0 %511 }
  0xfe   :  { %640 = vmatmul.mubr.msk.f32.gmra.mrb[6].mxu1 %vm227_vm10, %v178_v44 }
  0xff   :  { %658 = vmatprep.mubr.msk.f32.mxu1 %vm393_vm0, %v365_v45  ;;  %v517_v45 = vpop.permute.xlu1 %516 }
 0x1c5   :  { %v632_v50 = vpop.f32.mrb[0].mxu1 }
 0x1c6   :  { %v324_v51 = vadd.f32 %v632_v50, %v195_v48  ;;  %v318_v52 = vpop.f32.mrb[1].mxu1 }
 0x1c7   :  { %v319_v53 = vadd.f32 %v318_v52, %v190_v46  ;;  %v540_v52 = vsub.s32 0, %v763_v4 }
 0x1c8   :  { %v358_v54 = vmax.f32 %v324_v51, 0.0 }
 0x1c9   :  { %v357_v55 = vmax.f32 %v319_v53, 0.0  ;;  %v635_v56 = vpop.f32.mrb[2].mxu1 }
 0x1ca   :  { %v334_v57 = vadd.f32 %v635_v56, %v205_v49  ;;  %v328_v58 = vpop.f32.mrb[3].mxu1 }
 0x1cb   :  { %v680_v60 = vpack.c.bf16 %v358_v54, %v357_v55  ;;  %v329_v61 = vadd.f32 %v328_v58, %v200_v47  ;;  %v536_v54 = vpop.permute.xlu0 %535 }
 0x1cc   :  { %v360_v63 = vmax.f32 %v334_v57, 0.0  ;;  %v541_v56 = vrot.slane %v536_v54, %v540_v52 }
 0x1cd   :  { %v359_v0 = vmax.f32 %v329_v61, 0.0  ;;  %v638_v1 = vpop.f32.mrb[4].mxu1  ;;  %681 = vmatprep.subr.bf16.mxu1 %v680_v60 }
 0x1ce   :  { %v344_v2 = vadd.f32 %v638_v1, %v215_v59  ;;  %v338_v3 = vpop.f32.mrb[5].mxu1  ;;  %683 = vmatpush3.bf16.msra.mxu1 %v680_v60 }
 0x1cf   :  { %v684_v5 = vpack.c.bf16 %v360_v63, %v359_v0  ;;  %v339_v6 = vadd.f32 %v338_v3, %v210_v62 }
 0x1d0   :  { %v362_v7 = vmax.f32 %v344_v2, 0.0 }
 0x1d1   :  { %v361_v9 = vmax.f32 %v339_v6, 0.0  ;;  %v641_v10 = vpop.f32.mrb[6].mxu1  ;;  %685 = vmatprep.subr.bf16.mxu1 %v684_v5 }
 0x1d2   :  { %v354_v12 = vadd.f32 %v641_v10, %v225_v8  ;;  %v348_v13 = vpop.f32.mrb[7].mxu1  ;;  %687 = vmatpush3.bf16.msra.mxu1 %v684_v5 }
 0x1d3   :  { %v688_v14 = vpack.c.bf16 %v362_v7, %v361_v9  ;;  %v349_v15 = vadd.f32 %v348_v13, %v220_v11 }
 0x1d4   :  { %v364_v16 = vmax.f32 %v354_v12, 0.0 }
 0x1d5   :  { %v363_v17 = vmax.f32 %v349_v15, 0.0  ;;  %689 = vmatprep.subr.bf16.mxu1 %v688_v14 }
 0x1d6   :  { %691 = vmatpush3.bf16.msra.mxu1 %v688_v14 }
 0x1d7   :  { %v692_v18 = vpack.c.bf16 %v364_v16, %v363_v17 }
 0x1d9   :  { %693 = vmatprep.subr.bf16.mxu1 %v692_v18 }
 0x1da   :  { %695 = vmatpush3.bf16.msra.mxu1 %v692_v18 }
 0x1dd   :  { %659 = vmatmul.mubr.msk.f32.vlgmr.msra.gmra.mrb[8].mxu1 %vm393_vm0, %v366_v19 }
 0x1de   :  { %661 = vmatprep.mubr.msk.f32.mxu1 %vm393_vm0, %v367_v20 }
 0x1e1   :  { %662 = vmatmul.mubr.msk.f32.gmra.mrb[10].mxu1 %vm393_vm0, %v368_v21 }
 0x2b0   :  { %v660_v26 = vpop.f32.mrb[8].mxu1 }
 0x2b1   :  { %v478_v27 = vadd.f32 %v660_v26, %v381_v23  ;;  %v472_v28 = vpop.f32.mrb[9].mxu1 }
 0x2b2   :  { %v473_v29 = vadd.f32 %v472_v28, %v376_v22 }
 0x2b3   :  { %v492_v31 = vmax.f32 %v478_v27, 0.0 }
 0x2b4   :  { %v491_v33 = vmax.f32 %v473_v29, 0.0  ;;  %v663_v34 = vpop.f32.mrb[10].mxu1 }
 0x2b5   :  { %v520_v35 = vmul.f32 %v507_v32, %v492_v31  ;;  %v488_v36 = vadd.f32 %v663_v34, %v391_v25  ;;  %v482_v37 = vpop.f32.mrb[11].mxu1 }
 0x2b6   :  { %v519_v38 = vmul.f32 %v502_v30, %v491_v33  ;;  %v483_v39 = vadd.f32 %v482_v37, %v386_v24 }
 0x2b7   :  { %v494_v41 = vmax.f32 %v488_v36, 0.0 }
 0x2b8   :  { %v523_v40 = vadd.f32 %v520_v35, %v519_v38  ;;  %v493_v42 = vmax.f32 %v483_v39, 0.0 }
 0x2b9   :  { %v522_v46 = vmul.f32 %v517_v45, %v494_v41 }
 0x2ba   :  { %v521_v44 = vmul.f32 %v512_v43, %v493_v42 }
 0x2bc   :  { %v524_v47 = vadd.f32 %v523_v40, %v521_v44 }
 0x2be   :  { %v525_v48 = vadd.f32 %v524_v47, %v522_v46 }
 0x2c0   :  { %v526_v49 = vrot.slane %v525_v48, 4 }
 0x2c2   :  { %v527_v50 = vadd.f32 %v526_v49, %v525_v48 }
 0x2c4   :  { %v528_v51 = vrot.slane %v527_v50, 2 }
 0x2c6   :  { %v529_v53 = vadd.f32 %v528_v51, %v527_v50 }
 0x2c8   :  { %v530_v55 = vrot.slane %v529_v53, 1 }
 0x2ca   :  { %v531_v57 = vadd.f32 %v530_v55, %v529_v53 }
 0x2cc   :  { %v542_v58 = vadd.f32 %v541_v56, %v531_v57 }
 0x2ce   :  { %543 = vst [vmem:[%s896_s9] sm:$0x1] %v542_v58 }

</bundles_post_ra>
